<compile_context>
chip_gen: v6e
topology: v6e:2x2x1
jax: 0.10.0
libtpu: 0.0.40
codegen_flags: <defaults>
</compile_context>

<pallas_src>
import jax
import jax.numpy as jnp
from jax.experimental import pallas as pl
from jax.experimental.pallas import tpu as pltpu


def _round_up(x, m):
    return ((x + m - 1) // m) * m


def _hidden_tile(hidden_dim, max_tile=512):
    """Pick a tile size along the 4C hidden (reduction) dimension."""
    if hidden_dim <= max_tile:
        return hidden_dim
    for t in (max_tile, 256, 128):
        if hidden_dim % t == 0:
            return t
    return hidden_dim  # fallback: no hidden tiling


def ffn_kernel(x_ref, w1_ref, b1_ref, w2_ref, b2_ref, o_ref, acc_ref):
    """One (row-tile, hidden-tile) grid step of  out = relu(x@W1 + b1) @ W2 + b2."""
    h = pl.program_id(1)

    @pl.when(h == 0)
    def _():
        acc_ref[...] = jnp.zeros_like(acc_ref)

    # (tm, C) @ (C, th) -> (tm, th), f32 accumulation on the MXU
    hidden = jnp.dot(x_ref[...], w1_ref[...], preferred_element_type=jnp.float32)
    hidden = jnp.maximum(hidden + b1_ref[...], 0.0)
    # (tm, th) @ (th, C) -> accumulate into the resident (tm, C) accumulator
    acc_ref[...] += jnp.dot(hidden.astype(w2_ref.dtype), w2_ref[...],
                            preferred_element_type=jnp.float32)

    @pl.when(h == pl.num_programs(1) - 1)
    def _():
        o_ref[...] = (acc_ref[...] + b2_ref[...]).astype(o_ref.dtype)


def feed_forward2(x, params, *, m_tile=256):
    """Forward pass of FeedForward2.  x: (B, T, C); params in PyTorch nn.Linear layout."""
    B, T, C = x.shape
    H = 4 * C

    # PyTorch Linear stores weight as (out_features, in_features) and computes x @ W.T.
    # Pre-transpose once in the wrapper so the kernel always does x @ W.
    w1 = params["w1"].T                 # (C, 4C)
    b1 = params["b1"].reshape(1, H)     # (1, 4C)
    w2 = params["w2"].T                 # (4C, C)
    b2 = params["b2"].reshape(1, C)     # (1, C)

    M = B * T
    tm = _round_up(M, 8) if M < m_tile else m_tile
    M_pad = _round_up(M, tm)
    th = _hidden_tile(H)

    x2d = x.reshape(M, C)
    if M_pad != M:
        x2d = jnp.pad(x2d, ((0, M_pad - M), (0, 0)))

    grid = (M_pad // tm, H // th)

    out = pl.pallas_call(
        ffn_kernel,
        out_shape=jax.ShapeDtypeStruct((M_pad, C), x.dtype),
        grid_spec=pltpu.PrefetchScalarGridSpec(
            num_scalar_prefetch=0,
            grid=grid,
            in_specs=[
                pl.BlockSpec((tm, C), lambda m, h: (m, 0)),   # x row tile (reused over h)
                pl.BlockSpec((C, th), lambda m, h: (0, h)),   # W1 hidden-column tile
                pl.BlockSpec((1, th), lambda m, h: (0, h)),   # b1 tile
                pl.BlockSpec((th, C), lambda m, h: (h, 0)),   # W2 hidden-row tile
                pl.BlockSpec((1, C), lambda m, h: (0, 0)),    # b2 (constant block)
            ],
            out_specs=pl.BlockSpec((tm, C), lambda m, h: (m, 0)),
            scratch_shapes=[pltpu.VMEM((tm, C), jnp.float32)],
        ),
        compiler_params=pltpu.CompilerParams(
            dimension_semantics=("parallel", "arbitrary"),
            vmem_limit_bytes=64 * 1024 * 1024,
        ),
    )(x2d, w1, b1, w2, b2)

    return out[:M].reshape(B, T, C)


def make_params(key, C):
    """Deterministic init in PyTorch nn.Linear layout: weight (out, in), bias (out,)."""
    k1, k2, k3, k4 = jax.random.split(key, 4)
    s = 0.05
    return dict(
        w1=(jax.random.normal(k1, (4 * C, C)) * s).astype(jnp.float32),
        b1=(jax.random.normal(k2, (4 * C,)) * s).astype(jnp.float32),
        w2=(jax.random.normal(k3, (C, 4 * C)) * s).astype(jnp.float32),
        b2=(jax.random.normal(k4, (C,)) * s).astype(jnp.float32),
    )


def reference(x, p):
    """Plain-JAX reference of FeedForward2.forward (PyTorch Linear semantics)."""
    h = jnp.maximum(x @ p["w1"].T + p["b1"], 0.0)
    return h @ p["w2"].T + p["b2"]


if __name__ == "__main__":
    B, T, C = 2, 8, 32

    key = jax.random.PRNGKey(0)
    kx, kp = jax.random.split(key)
    x = jax.random.normal(kx, (B, T, C), dtype=jnp.float32)
    params = make_params(kp, C)

    out = feed_forward2(x, params)
    out = jax.block_until_ready(out)

    ref = reference(x, params)
    assert out.shape == (B, T, C)
    assert jnp.allclose(out, ref, atol=1e-4, rtol=1e-4), "mismatch vs reference"

    print("KERNEL_OK")
</pallas_src>

<mosaic_0001>
module attributes {stable_mosaic.version = 11 : i64} {
  func.func @ffn_kernel(%arg0: i32, %arg1: i32, %arg2: memref<16x32xf32, #tpu.memory_space<vmem>>, %arg3: memref<32x128xf32, #tpu.memory_space<vmem>>, %arg4: memref<1x128xf32, #tpu.memory_space<vmem>>, %arg5: memref<128x32xf32, #tpu.memory_space<vmem>>, %arg6: memref<1x32xf32, #tpu.memory_space<vmem>>, %arg7: memref<16x32xf32, #tpu.memory_space<vmem>>, %arg8: memref<16x32xf32, #tpu.memory_space<vmem>>) attributes {dimension_semantics = [#tpu.dimension_semantics<parallel>, #tpu.dimension_semantics<arbitrary>], iteration_bounds = array<i64: 1, 1>, scalar_prefetch = 0 : i64, scratch_operands = 1 : i64, tpu.core_type = #tpu.core_type<tc>, window_params = [{transform_indices = @transform_0, window_bounds = array<i64: 16, 32>}, {transform_indices = @transform_1, window_bounds = array<i64: 32, 128>}, {transform_indices = @transform_2, window_bounds = array<i64: 1, 128>}, {transform_indices = @transform_3, window_bounds = array<i64: 128, 32>}, {pipeline_mode = #tpu.pipeline_mode<synchronous>, transform_indices = @transform_4, window_bounds = array<i64: 1, 32>}, {transform_indices = @transform_5, window_bounds = array<i64: 16, 32>}]} {
    %c0_i32 = arith.constant 0 : i32
    %0 = arith.cmpi eq, %arg1, %c0_i32 : i32
    %1 = arith.extui %0 : i1 to i32
    %c0_i32_0 = arith.constant 0 : i32
    %2 = arith.cmpi ne, %1, %c0_i32_0 : i32
    scf.if %2 {
      %cst_16 = arith.constant 0.000000e+00 : f32
      %19 = vector.broadcast %cst_16 : f32 to vector<16x32xf32>
      %c0_17 = arith.constant 0 : index
      %c0_18 = arith.constant 0 : index
      %20 = vector.load %arg8[%c0_17, %c0_18] : memref<16x32xf32, #tpu.memory_space<vmem>>, vector<16x32xf32>
      tpu.vector_store %arg8[%c0_17, %c0_18], %19 {strides = array<i32>} : memref<16x32xf32, #tpu.memory_space<vmem>>, vector<16x32xf32>,
    } else {
    }
    %c0 = arith.constant 0 : index
    %c0_1 = arith.constant 0 : index
    %3 = vector.load %arg2[%c0, %c0_1] : memref<16x32xf32, #tpu.memory_space<vmem>>, vector<16x32xf32>
    %c0_2 = arith.constant 0 : index
    %c0_3 = arith.constant 0 : index
    %4 = vector.load %arg3[%c0_2, %c0_3] : memref<32x128xf32, #tpu.memory_space<vmem>>, vector<32x128xf32>
    %cst = arith.constant dense<0.000000e+00> : vector<16x128xf32>
    %5 = tpu.matmul %3, %4, %cst {dimension_numbers = #tpu.dot_dimension_numbers<[1], [0], [0], [1], [0, 0, 1, 1], [], []>} : vector<16x32xf32>, vector<32x128xf32>, vector<16x128xf32> -> vector<16x128xf32>
    %c0_4 = arith.constant 0 : index
    %c0_5 = arith.constant 0 : index
    %6 = vector.load %arg4[%c0_4, %c0_5] : memref<1x128xf32, #tpu.memory_space<vmem>>, vector<1x128xf32>
    %7 = vector.broadcast %6 : vector<1x128xf32> to vector<16x128xf32>
    %8 = arith.addf %5, %7 : vector<16x128xf32>
    %cst_6 = arith.constant 0.000000e+00 : f32
    %9 = vector.broadcast %cst_6 : f32 to vector<16x128xf32>
    %10 = arith.maximumf %8, %9 : vector<16x128xf32>
    %c0_7 = arith.constant 0 : index
    %c0_8 = arith.constant 0 : index
    %11 = vector.load %arg8[%c0_7, %c0_8] : memref<16x32xf32, #tpu.memory_space<vmem>>, vector<16x32xf32>
    %c0_9 = arith.constant 0 : index
    %c0_10 = arith.constant 0 : index
    %12 = vector.load %arg5[%c0_9, %c0_10] : memref<128x32xf32, #tpu.memory_space<vmem>>, vector<128x32xf32>
    %cst_11 = arith.constant dense<0.000000e+00> : vector<16x32xf32>
    %13 = tpu.matmul %10, %12, %cst_11 {dimension_numbers = #tpu.dot_dimension_numbers<[1], [0], [0], [1], [0, 0, 1, 1], [], []>} : vector<16x128xf32>, vector<128x32xf32>, vector<16x32xf32> -> vector<16x32xf32>
    %14 = arith.addf %11, %13 : vector<16x32xf32>
    %c0_12 = arith.constant 0 : index
    %c0_13 = arith.constant 0 : index
    %15 = vector.load %arg8[%c0_12, %c0_13] : memref<16x32xf32, #tpu.memory_space<vmem>>, vector<16x32xf32>
    tpu.vector_store %arg8[%c0_12, %c0_13], %14 {strides = array<i32>} : memref<16x32xf32, #tpu.memory_space<vmem>>, vector<16x32xf32>,
    %c0_i32_14 = arith.constant 0 : i32
    %16 = arith.cmpi eq, %arg1, %c0_i32_14 : i32
    %17 = arith.extui %16 : i1 to i32
    %c0_i32_15 = arith.constant 0 : i32
    %18 = arith.cmpi ne, %17, %c0_i32_15 : i32
    scf.if %18 {
      %c0_16 = arith.constant 0 : index
      %c0_17 = arith.constant 0 : index
      %19 = vector.load %arg8[%c0_16, %c0_17] : memref<16x32xf32, #tpu.memory_space<vmem>>, vector<16x32xf32>
      %c0_18 = arith.constant 0 : index
      %c0_19 = arith.constant 0 : index
      %20 = vector.load %arg6[%c0_18, %c0_19] : memref<1x32xf32, #tpu.memory_space<vmem>>, vector<1x32xf32>
      %21 = vector.broadcast %20 : vector<1x32xf32> to vector<16x32xf32>
      %22 = arith.addf %19, %21 : vector<16x32xf32>
      %c0_20 = arith.constant 0 : index
      %c0_21 = arith.constant 0 : index
      %23 = vector.load %arg7[%c0_20, %c0_21] : memref<16x32xf32, #tpu.memory_space<vmem>>, vector<16x32xf32>
      tpu.vector_store %arg7[%c0_20, %c0_21], %22 {strides = array<i32>} : memref<16x32xf32, #tpu.memory_space<vmem>>, vector<16x32xf32>,
    } else {
    }
    return
  }
  func.func @transform_0(%arg0: i32, %arg1: i32) -> (i32, i32) {
    %c0_i32 = arith.constant 0 : i32
    %c0_i32_0 = arith.constant 0 : i32
    return %arg0, %c0_i32 : i32, i32
  }
  func.func @transform_1(%arg0: i32, %arg1: i32) -> (i32, i32) {
    %c0_i32 = arith.constant 0 : i32
    %c0_i32_0 = arith.constant 0 : i32
    return %c0_i32, %arg1 : i32, i32
  }
  func.func @transform_2(%arg0: i32, %arg1: i32) -> (i32, i32) {
    %c0_i32 = arith.constant 0 : i32
    %c0_i32_0 = arith.constant 0 : i32
    return %c0_i32, %arg1 : i32, i32
  }
  func.func @transform_3(%arg0: i32, %arg1: i32) -> (i32, i32) {
    %c0_i32 = arith.constant 0 : i32
    %c0_i32_0 = arith.constant 0 : i32
    return %arg1, %c0_i32 : i32, i32
  }
  func.func @transform_4(%arg0: i32, %arg1: i32) -> (i32, i32) {
    %c0_i32 = arith.constant 0 : i32
    %c0_i32_0 = arith.constant 0 : i32
    %c0_i32_1 = arith.constant 0 : i32
    return %c0_i32, %c0_i32_0 : i32, i32
  }
  func.func @transform_5(%arg0: i32, %arg1: i32) -> (i32, i32) {
    %c0_i32 = arith.constant 0 : i32
    %c0_i32_0 = arith.constant 0 : i32
    return %arg0, %c0_i32 : i32, i32
  }
}

</mosaic_0001>

<bundles_post_ra>
// kernel: tpu_custom_call.1
= control target key start
LH: loop header
LB: loop body
LE: loop exit
PB: predicated region body
PF: predicated region fallthrough
CT: control target
= control target key end

     0   :  { %vm25_vm0 = vcmask 261120   ;;  %s471_s0 = inlined_call_operand.vmem [shape: f32[16,32], index: 0, kind: input, shape index: {}]   ;;  %s472_s1 = inlined_call_operand.vmem [shape: f32[32,128], index: 1, kind: input, shape index: {}]   ;;  %s473_s2 = inlined_call_operand.vmem [shape: f32[1,128], index: 2, kind: input, shape index: {}]   ;;  %s474_s3 = inlined_call_operand.vmem [shape: f32[128,32], index: 3, kind: input, shape index: {}]   ;;  %s475_s4 = inlined_call_operand.vmem [shape: f32[1,32], index: 4, kind: input, shape index: {}]   ;;  %s476_s5 = inlined_call_operand.hbm [shape: f32[16,32], index: 5, kind: output, shape index: {}]  }
   0x1   :  { %v33_v0 = vld [vmem:[%s472_s1 + $0x18] sm:$0xff]  ;;  %v32_v1 = vld [vmem:[%s472_s1 + $0x10] sm:$0xff]  ;;  %v28_v2 = vld [vmem:[%s471_s0] sm:$0xff] }
   0x2   :  { %282 = vmatprep.subr.mxu0 %v33_v0  ;;  %v31_v3 = vld [vmem:[%s472_s1 + $0x8] sm:$0xff]  ;;  %290 = vmatprep.mubr.msk.f32.mxu0 %vm25_vm0, %v28_v2  ;;  %v142_v4 = vld [vmem:[%s474_s3 + $0x78] sm:$0xff]  ;;  %v141_v5 = vld [vmem:[%s474_s3 + $0x70] sm:$0xff] }
   0x3   :  { %283 = vmatpush3.msra.mxu0 %v33_v0  ;;  %293 = vmatprep.subr.mxu1 %v142_v4  ;;  %v30_v6 = vld [vmem:[%s472_s1] sm:$0xff]  ;;  %v140_v7 = vld [vmem:[%s474_s3 + $0x68] sm:$0xff] }
   0x4   :  { %284 = vmatprep.subr.mxu0 %v32_v1  ;;  %294 = vmatpush3.msra.mxu1 %v142_v4  ;;  %v29_v8 = vld [vmem:[%s471_s0 + $0x8] sm:$0xff]  ;;  %v139_v9 = vld [vmem:[%s474_s3 + $0x60] sm:$0xff] }
   0x5   :  { %285 = vmatpush3.msra.mxu0 %v32_v1  ;;  %295 = vmatprep.subr.mxu1 %v141_v5 }
   0x6   :  { %286 = vmatprep.subr.mxu0 %v31_v3  ;;  %296 = vmatpush3.msra.mxu1 %v141_v5 }
   0x7   :  { %287 = vmatpush3.msra.mxu0 %v31_v3 }
   0x8   :  { %10 = vsyncpa [#allocation4], 0  ;;  %288 = vmatprep.subr.mxu0 %v30_v6  ;;  %297 = vmatprep.subr.mxu1 %v140_v7  ;;  %v138_v10 = vld [vmem:[%s474_s3 + $0x58] sm:$0xff]  ;;  %v137_v11 = vld [vmem:[%s474_s3 + $0x50] sm:$0xff]  ;;  %v354_v22 = vmov 0.0   ;;  %s355_s12 = smov [#allocation3]  }
   0x9   :  { %289 = vmatpush3.msra.mxu0 %v30_v6  ;;  %298 = vmatpush3.msra.mxu1 %v140_v7  ;;  %v136_v12 = vld [vmem:[%s474_s3 + $0x48] sm:$0xff]  ;;  %v135_v13 = vld [vmem:[%s474_s3 + $0x40] sm:$0xff]  ;;  %v134_v14 = vld [vmem:[%s474_s3 + $0x38] sm:$0xff]  ;;  %27 = vst.msk [vmem:[#allocation2 + $0x8] sm:$0xff] %vm25_vm0, %v354_v22  ;;  %s243_s1 = sshll.u32 %s355_s12, 4  ;;  %s244_s1 = int_to_ptr.vmem [resolvable:$true] %s243_s1 }
   0xa   :  { %291 = vmatmul.mubr.msk.f32.vlgmr.msra.gmra.mxu0 %vm25_vm0, %v29_v8  ;;  %299 = vmatprep.subr.mxu1 %v139_v9  ;;  %v133_v15 = vld [vmem:[%s474_s3 + $0x30] sm:$0xff]  ;;  %v132_v16 = vld [vmem:[%s474_s3 + $0x28] sm:$0xff]  ;;  %v131_v17 = vld [vmem:[%s474_s3 + $0x20] sm:$0xff]  ;;  %26 = vst.msk [vmem:[#allocation2] sm:$0xff] %vm25_vm0, %v354_v22  ;;  %s332_s13 = scalar_lea.vmem %s244_s1, 256  ;;  %p337_p1 = scmp.lt.s32.totalorder %s244_s1, %s244_s1 }
   0xb   :  { %300 = vmatpush3.msra.mxu1 %v139_v9  ;;  %v130_v18 = vld [vmem:[%s474_s3 + $0x18] sm:$0xff]  ;;  %v129_v19 = vld [vmem:[%s474_s3 + $0x10] sm:$0xff]  ;;  %v128_v20 = vld [vmem:[%s474_s3 + $0x8] sm:$0xff]  ;;  %p333_p0 = scmp.ne.s32.totalorder %s244_s1, %s332_s13  ;;  %p338_p2 = scmp.lt.s32.totalorder %s332_s13, %s332_s13 }
   0xc   :  { %301 = vmatprep.subr.mxu1 %v138_v10  ;;  %v127_v21 = vld [vmem:[%s474_s3] sm:$0xff] }
   0xd   :  { %302 = vmatpush3.msra.mxu1 %v138_v10  ;;  %v254_v23 = vld [vmem:[%s473_s2] ss:$0 sm:$0xff]  ;;  %p339_p3 = por %p338_p2, %p337_p1 }
   0xe   :  { %303 = vmatprep.subr.mxu1 %v137_v11  ;;  %v257_v36 = vld [vmem:[%s475_s4] ss:$0 sm:$0xff] }
   0xf   :  { %304 = vmatpush3.msra.mxu1 %v137_v11  ;;  %p340_p4 = pnand %p339_p3, %p333_p0 }
  0x10   :  { %305 = vmatprep.subr.mxu1 %v136_v12  ;;  %v126_v30 = vld [vmem:[#allocation2 + $0x8] sm:$0xff] }
  0x11   :  { %306 = vmatpush3.msra.mxu1 %v136_v12  ;;  %v125_v32 = vld [vmem:[#allocation2] sm:$0xff] }
  0x12   :  { %307 = vmatprep.subr.mxu1 %v135_v13 }
  0x13   :  { %308 = vmatpush3.msra.mxu1 %v135_v13 }
  0x14   :  { %309 = vmatprep.subr.mxu1 %v134_v14 }
  0x15   :  { %310 = vmatpush3.msra.mxu1 %v134_v14 }
  0x16   :  { %311 = vmatprep.subr.mxu1 %v133_v15 }
  0x17   :  { %312 = vmatpush3.msra.mxu1 %v133_v15 }
  0x18   :  { %313 = vmatprep.subr.mxu1 %v132_v16 }
  0x19   :  { %314 = vmatpush3.msra.mxu1 %v132_v16 }
  0x1a   :  { %315 = vmatprep.subr.mxu1 %v131_v17 }
  0x1b   :  { %316 = vmatpush3.msra.mxu1 %v131_v17 }
  0x1c   :  { %317 = vmatprep.subr.mxu1 %v130_v18 }
  0x1d   :  { %318 = vmatpush3.msra.mxu1 %v130_v18 }
  0x1e   :  { %319 = vmatprep.subr.mxu1 %v129_v19 }
  0x1f   :  { %320 = vmatpush3.msra.mxu1 %v129_v19 }
  0x20   :  { %321 = vmatprep.subr.mxu1 %v128_v20 }
  0x21   :  { %322 = vmatpush3.msra.mxu1 %v128_v20 }
  0x22   :  { %323 = vmatprep.subr.mxu1 %v127_v21 }
  0x23   :  { %324 = vmatpush3.msra.mxu1 %v127_v21 }
  0xca   :  { %v292_v24 = vpop.f32.mrf.mxu0 }
  0xcb   :  { %v120_v25 = vadd.f32 %v292_v24, %v254_v23 }
  0xcc   :  { %v114_v26 = vpop.f32.mrf.mxu0 }
  0xcd   :  { %v115_v27 = vadd.f32 %v254_v23, %v114_v26  ;;  %v124_v29 = vmax.f32 %v120_v25, 0.0 }
  0xcf   :  { %v123_v28 = vmax.f32 %v115_v27, 0.0 }
  0xd1   :  { %325 = vmatprep.mubr.f32.mxu1 %v123_v28 }
  0xd2   :  { %326 = vmatmul.mubr.f32.vlgmr.msra.gmra.mxu1 %v124_v29 }
 0x192   :  { %v327_v31 = vpop.f32.mrf.mxu1 }
 0x193   :  { %v219_v33 = vadd.f32 %v327_v31, %v126_v30 }
 0x194   :  { %v209_v34 = vpop.f32.mrf.mxu1 }
 0x195   :  { %221 = vst.msk [vmem:[#allocation2 + $0x8] sm:$0xff] %vm25_vm0, %v219_v33  ;;  %v218_v35 = vadd.f32 %v209_v34, %v125_v32 }
 0x197   :  { %220 = vst.msk [vmem:[#allocation2] sm:$0xff] %vm25_vm0, %v218_v35 }
 0x19c   :  { %v226_v37 = vld [vmem:[#allocation2 + $0x8] sm:$0xff] }
 0x19d   :  { %v235_v38 = vadd.f32 %v257_v36, %v226_v37 }
 0x19e   :  { %v225_v39 = vld [vmem:[#allocation2] sm:$0xff] }
 0x19f   :  { %v234_v40 = vadd.f32 %v257_v36, %v225_v39  ;;  %237 = vst.msk [vmem:[#allocation3 + $0x8] sm:$0xff] %vm25_vm0, %v235_v38 }
 0x1a1   :  { %236 = vst.msk [vmem:[#allocation3] sm:$0xff] %vm25_vm0, %v234_v40 }
 0x1a2   :  { %343 = shalt.err (!%p340_p4)
}
 0x1a3   :  { %s356_s14 = smov 128   ;;  %s357_s4 = smov 8  }
 0x1a4   :  { %249 = dma.vmem_to_hbm [thread:$0]  %s244_s1, 256, %s476_s5, [#allocation4], %s356_s14, %s356_s14, %s357_s4  }
 0x1a5   :  { %352 = dma.done.wait [#allocation4], 256  }
 0x1a6   :  { %353 = vsyncadd [#allocation4], 4294967040 }
 0x1a7   :  { %253 = vsyncpa [#allocation4], 1 }

</bundles_post_ra>
